<compile_context>
chip_gen: v7x
topology: tpu7x:2x2x1
jax: 0.10.0
libtpu: 0.0.40
codegen_flags: <defaults>
</compile_context>

<pallas_src>
import functools

import jax
import jax.numpy as jnp
from jax.experimental import pallas as pl
from jax.experimental.pallas import tpu as pltpu

LANE = 128
MM_DTYPE = jnp.bfloat16   # matmul-operand dtype (f32 accumulation everywhere)


def _round_up(n, m=LANE):
    return pl.cdiv(n, m) * m


def _pad2(x, rows, cols):
    return jnp.pad(x, ((0, rows - x.shape[0]), (0, cols - x.shape[1])))


# ------------------------------ fused kernel ---------------------------------
def _fused_kernel(pat_ref, pool_ref, bnavg_ref, wc_ref, w1_ref, w2_ref, w3_ref,
                  vT_ref, sb_ref, q_ref):
    eps = 1e-5
    f32 = jnp.float32
    Hp = w1_ref.shape[-1]
    Op = w3_ref.shape[-1]

    # ---- encoder stub: conv-as-matmul (bf16 operands, f32 acc) + ReLU ----
    y = jnp.dot(pat_ref[...], wc_ref[0], preferred_element_type=f32)   # (VM, Cp)
    y = jnp.maximum(y, 0.0)
    # Global average pool per (view, sample): constant block-diagonal pooling
    # matrix on the MXU; kept f32 to preserve activation precision.
    feats = jnp.dot(pool_ref[...], y, preferred_element_type=f32)      # (VN, Cp)

    B = bnavg_ref[...]          # (VN, VN) per-view averaging matrix (entries 1/N)
    sb = sb_ref[0]              # packed (g1, b1, g2, b2, b3), zero-padded lanes
    g1, b1 = sb[0:1, :Hp], sb[1:2, :Hp]
    g2, b2 = sb[2:3, :Hp], sb[3:4, :Hp]
    b3 = sb[4:5, :Op]

    # ---- projector: (Linear no-bias -> BatchNorm1d(batch stats) -> ReLU) x2 ----
    def linear_bn_relu(h, w_ref, g, b):
        z = jnp.dot(h.astype(MM_DTYPE), w_ref[0], preferred_element_type=f32)
        mu = jnp.dot(B, z, preferred_element_type=f32)        # per-view mean
        d = z - mu
        var = jnp.dot(B, d * d, preferred_element_type=f32)   # two-pass variance
        zn = d * jax.lax.rsqrt(var + eps)
        # g/b are ZERO in padded lanes so padded lanes stay exactly 0.
        return jnp.maximum(g * zn + b, 0.0)

    h = linear_bn_relu(feats, w1_ref, g1, b1)
    h = linear_bn_relu(h, w2_ref, g2, b2)

    # ---- final Linear (bias) -> F.normalize(dim=1) -> weight-norm head ----
    p = jnp.dot(h.astype(MM_DTYPE), w3_ref[0], preferred_element_type=f32) + b3
    # PyTorch guard max(||p||, 1e-12) == sqrt(max(sum p^2, 1e-24)); EUP rsqrt.
    inv_norm = jax.lax.rsqrt(
        jnp.maximum(jnp.sum(p * p, axis=1, keepdims=True), 1e-24))
    pn = p * inv_norm
    # weight-norm head (weight_g == 1): q = pn @ vhat^T, vhat pre-normalized.
    q_ref[0] = jnp.dot(pn.astype(MM_DTYPE), vT_ref[0], preferred_element_type=f32)


def _fused_forward(pat, P, B, w, num_models, VN):
    """Single pallas_call covering all views AND both (online, EMA) weight sets."""
    VM, K = pat.shape
    Cp = w["w_conv"].shape[-1]
    Hp = w["w1"].shape[-1]
    Op = w["w3"].shape[-1]
    Pp = w["vhatT"].shape[-1]
    SBW = w["sb"].shape[-1]

    per_model = lambda mdl: (mdl, 0, 0)   # weights: one block per weight set
    resident = lambda mdl: (0, 0)         # data: DMA once, resident across models

    return pl.pallas_call(
        _fused_kernel,
        out_shape=jax.ShapeDtypeStruct((num_models, VN, Pp), jnp.float32),
        grid=(num_models,),
        in_specs=[
            pl.BlockSpec((VM, K), resident),        # im2col patches (bf16)
            pl.BlockSpec((VN, VM), resident),       # GAP pooling matrix (f32)
            pl.BlockSpec((VN, VN), resident),       # per-view BN averaging (f32)
            pl.BlockSpec((1, K, Cp), per_model),    # conv weight
            pl.BlockSpec((1, Cp, Hp), per_model),   # projector w1
            pl.BlockSpec((1, Hp, Hp), per_model),   # projector w2
            pl.BlockSpec((1, Hp, Op), per_model),   # projector w3
            pl.BlockSpec((1, Op, Pp), per_model),   # normalized head direction^T
            pl.BlockSpec((1, 8, SBW), per_model),   # packed (g1,b1,g2,b2,b3)
        ],
        out_specs=pl.BlockSpec((1, VN, Pp), per_model),
        compiler_params=pltpu.CompilerParams(
            dimension_semantics=("parallel",)),     # feeds both v7x TCs when ==2
    )(pat, P, B, w["w_conv"], w["w1"], w["w2"], w["w3"], w["vhatT"], w["sb"])


# ------------------------------ host-side prep -------------------------------
def _prep_weights(params):
    """Pad feature dims to 128 lanes, hoist the constant weight-norm direction,
    cast matmul operands to bf16, pack BN scale/bias + final bias into one slab."""
    K, FEAT = params["w_conv"].shape
    HID = params["w1"].shape[1]
    OUT = params["w3"].shape[1]
    PROT = params["v_head"].shape[0]
    Cp, Hp, Op, Pp = (_round_up(d) for d in (FEAT, HID, OUT, PROT))
    SBW = max(Hp, Op)

    v = params["v_head"].astype(jnp.float32)                          # (PROT, OUT)
    vhat = v * jax.lax.rsqrt(jnp.sum(v * v, axis=1, keepdims=True))   # weight_g == 1

    # NOTE: gamma/beta MUST be zero-padded (not ones) so padded lanes stay 0.
    sb = jnp.zeros((8, SBW), jnp.float32)
    sb = sb.at[0, :HID].set(params["g1"].reshape(-1))
    sb = sb.at[1, :HID].set(params["b1"].reshape(-1))
    sb = sb.at[2, :HID].set(params["g2"].reshape(-1))
    sb = sb.at[3, :HID].set(params["b2"].reshape(-1))
    sb = sb.at[4, :OUT].set(params["b3"].reshape(-1))

    w = {
        "w_conv": _pad2(params["w_conv"], K, Cp).astype(MM_DTYPE),
        "w1": _pad2(params["w1"], Cp, Hp).astype(MM_DTYPE),
        "w2": _pad2(params["w2"], Hp, Hp).astype(MM_DTYPE),
        "w3": _pad2(params["w3"], Hp, Op).astype(MM_DTYPE),
        "vhatT": _pad2(vhat.T, Op, Pp).astype(MM_DTYPE),
        "sb": sb,
    }
    return w, PROT


def _stack_models(wlist):
    return {k: jnp.stack([w[k] for w in wlist], axis=0) for k in wlist[0]}


def _im2col(x_views):
    """(V, N, Cin, H, W) -> (V*N*H*W, 9*Cin) bf16 im2col for a 3x3 'same' conv.
    K dim is intentionally NOT lane-padded (full-array block handles layout)."""
    V, N, Cin, H, W = x_views.shape
    xp = jnp.pad(x_views, ((0, 0), (0, 0), (0, 0), (1, 1), (1, 1)))
    taps = [xp[..., dy:dy + H, dx:dx + W] for dy in range(3) for dx in range(3)]
    pat = jnp.stack(taps, axis=2)                                     # (V, N, 9, Cin, H, W)
    pat = pat.transpose(0, 1, 4, 5, 2, 3).reshape(V * N * H * W, 9 * Cin)
    return pat.astype(MM_DTYPE)


def _pool_mats(V, N, HW):
    """GAP pooling matrix (VN, VN*HW) with entries 1/HW (block diagonal) and the
    per-view BN averaging matrix (VN, VN) with entries 1/N (block diagonal)."""
    VN = V * N
    P = jnp.kron(jnp.eye(VN, dtype=jnp.float32),
                 jnp.ones((1, HW), jnp.float32) / HW)
    B = jnp.kron(jnp.eye(V, dtype=jnp.float32),
                 jnp.ones((N, N), jnp.float32) / N)
    return P, B


# -------------------------------- model forward ------------------------------
@functools.partial(jax.jit, static_argnames=("momentum",))
def _forward_impl(params, ema_params, x_views, momentum):
    V, N, Cin, H, W = x_views.shape
    VN = V * N

    pat = _im2col(x_views)
    P, B = _pool_mats(V, N, H * W)

    w_on, PROT = _prep_weights(params)
    if momentum:
        w_ema, _ = _prep_weights(ema_params)
        w = _stack_models([w_on, w_ema])
        num_models = 2
    else:
        w = _stack_models([w_on])
        num_models = 1

    q_all = _fused_forward(pat, P, B, w, num_models, VN)      # (NM, VN, Pp)
    return q_all[:, :, :PROT].reshape(num_models, V, N, PROT)  # strip lane pad


def model_forward(params, ema_params, x, momentum=False, m=-1.0):
    # TODO(synk): m >= 0 EMA weight update is not part of the forward math here.
    xs = x if isinstance(x, (list, tuple)) else [x]
    x_views = jnp.stack(xs, axis=0)                           # (V, N, Cin, H, W)
    V = x_views.shape[0]
    q_all = _forward_impl(params, ema_params, x_views, momentum=momentum)
    outs = {"q": [q_all[0, v] for v in range(V)]}
    if momentum:
        # EMA branch is computed for all V views inside the fused call; only the
        # first min(2, V) are returned (matches x[:2] in the PyTorch code).
        outs["k"] = [q_all[1, v] for v in range(min(2, V))]
    return outs


# ------------------------------ pure-JAX reference ---------------------------
def _reference(params, x_nchw):
    """Mirrors the module forward with the same bf16 matmul-operand precision."""
    N, Cin, H, W = x_nchw.shape
    cast = lambda a: a.astype(MM_DTYPE)
    mm = lambda a, b: jnp.dot(cast(a), cast(b), preferred_element_type=jnp.float32)

    xp = jnp.pad(x_nchw, ((0, 0), (0, 0), (1, 1), (1, 1)))
    taps = [xp[:, :, dy:dy + H, dx:dx + W] for dy in range(3) for dx in range(3)]
    pat = jnp.stack(taps, 1).transpose(0, 3, 4, 1, 2).reshape(N * H * W, 9 * Cin)
    y = jnp.maximum(mm(pat, params["w_conv"]), 0.0)
    feats = y.reshape(N, H * W, -1).mean(axis=1)
    eps = 1e-5

    def bn_relu(z, g, b):
        mu = z.mean(0, keepdims=True)
        var = ((z - mu) ** 2).mean(0, keepdims=True)
        return jnp.maximum(g * (z - mu) / jnp.sqrt(var + eps) + b, 0.0)

    h = bn_relu(mm(feats, params["w1"]), params["g1"], params["b1"])
    h = bn_relu(mm(h, params["w2"]), params["g2"], params["b2"])
    p = mm(h, params["w3"]) + params["b3"]
    pn = p / jnp.maximum(jnp.linalg.norm(p, axis=1, keepdims=True), 1e-12)
    v = params["v_head"]
    vhat = v / jnp.linalg.norm(v, axis=1, keepdims=True)
    return mm(pn, vhat.T)


# ------------------------------------ main ------------------------------------
if __name__ == "__main__":
    N, Cin, H, W = 2, 4, 8, 8
    FEAT, HID, OUT, PROT = 32, 64, 32, 64   # feat_dim, proj_hidden_dim, out_dim, num_prototypes

    key = jax.random.PRNGKey(0)
    keys = jax.random.split(key, 8)

    def init(k, shape, fan_in):
        return (jax.random.normal(k, shape, jnp.float32) / jnp.sqrt(fan_in)).astype(jnp.float32)

    params = {
        "w_conv": init(keys[0], (9 * Cin, FEAT), 9 * Cin),
        "w1": init(keys[1], (FEAT, HID), FEAT),
        "g1": jnp.ones((1, HID), jnp.float32),
        "b1": jnp.zeros((1, HID), jnp.float32),
        "w2": init(keys[2], (HID, HID), HID),
        "g2": jnp.ones((1, HID), jnp.float32),
        "b2": jnp.zeros((1, HID), jnp.float32),
        "w3": init(keys[3], (HID, OUT), HID),
        "b3": jnp.zeros((1, OUT), jnp.float32),
        "v_head": init(keys[4], (PROT, OUT), OUT),
    }
    # EMA model params are copied from the online model at init time.
    ema_params = jax.tree_util.tree_map(lambda a: a, params)

    x1 = jax.random.normal(keys[5], (N, Cin, H, W), jnp.float32)
    x2 = jax.random.normal(keys[6], (N, Cin, H, W), jnp.float32)

    outs = model_forward(params, ema_params, [x1, x2], momentum=True)
    jax.block_until_ready(outs)

    assert outs["q"][0].shape == (N, PROT)
    assert outs["q"][1].shape == (N, PROT)
    assert outs["k"][0].shape == (N, PROT)

    # bf16 matmul operands (f32 accumulation) on both sides -> mixed-precision
    # tolerance; outputs are in [-1, 1] (normalized features vs unit prototypes).
    ref1 = _reference(params, x1)
    ref2 = _reference(params, x2)
    assert jnp.allclose(outs["q"][0], ref1, atol=1e-2, rtol=1e-2)
    assert jnp.allclose(outs["q"][1], ref2, atol=1e-2, rtol=1e-2)
    assert jnp.allclose(outs["k"][0], ref1, atol=1e-2, rtol=1e-2)  # ema == online at init
    assert jnp.allclose(outs["k"][1], ref2, atol=1e-2, rtol=1e-2)

    print("KERNEL_OK")
</pallas_src>

<mosaic_0001>
module attributes {stable_mosaic.version = 11 : i64} {
  func.func @_fused_kernel(%arg0: i32, %arg1: memref<256x36xbf16, #tpu.memory_space<vmem>>, %arg2: memref<4x256xf32, #tpu.memory_space<vmem>>, %arg3: memref<4x4xf32, #tpu.memory_space<vmem>>, %arg4: memref<1x36x128xbf16, #tpu.memory_space<vmem>>, %arg5: memref<1x128x128xbf16, #tpu.memory_space<vmem>>, %arg6: memref<1x128x128xbf16, #tpu.memory_space<vmem>>, %arg7: memref<1x128x128xbf16, #tpu.memory_space<vmem>>, %arg8: memref<1x128x128xbf16, #tpu.memory_space<vmem>>, %arg9: memref<1x8x128xf32, #tpu.memory_space<vmem>>, %arg10: memref<1x4x128xf32, #tpu.memory_space<vmem>>) attributes {dimension_semantics = [#tpu.dimension_semantics<parallel>], iteration_bounds = array<i64: 2>, scalar_prefetch = 0 : i64, scratch_operands = 0 : i64, tpu.core_type = #tpu.core_type<tc>, window_params = [{pipeline_mode = #tpu.pipeline_mode<synchronous>, transform_indices = @transform_0, window_bounds = array<i64: 256, 36>}, {pipeline_mode = #tpu.pipeline_mode<synchronous>, transform_indices = @transform_1, window_bounds = array<i64: 4, 256>}, {pipeline_mode = #tpu.pipeline_mode<synchronous>, transform_indices = @transform_2, window_bounds = array<i64: 4, 4>}, {transform_indices = @transform_3, window_bounds = array<i64: 1, 36, 128>}, {transform_indices = @transform_4, window_bounds = array<i64: 1, 128, 128>}, {transform_indices = @transform_5, window_bounds = array<i64: 1, 128, 128>}, {transform_indices = @transform_6, window_bounds = array<i64: 1, 128, 128>}, {transform_indices = @transform_7, window_bounds = array<i64: 1, 128, 128>}, {transform_indices = @transform_8, window_bounds = array<i64: 1, 8, 128>}, {transform_indices = @transform_9, window_bounds = array<i64: 1, 4, 128>}]} {
    %c0 = arith.constant 0 : index
    %c0_0 = arith.constant 0 : index
    %0 = vector.load %arg1[%c0, %c0_0] : memref<256x36xbf16, #tpu.memory_space<vmem>>, vector<256x36xbf16>
    %c0_1 = arith.constant 0 : index
    %c0_2 = arith.constant 0 : index
    %c0_3 = arith.constant 0 : index
    %1 = vector.load %arg4[%c0_1, %c0_2, %c0_3] : memref<1x36x128xbf16, #tpu.memory_space<vmem>>, vector<1x36x128xbf16>
    %2 = vector.shape_cast %1 : vector<1x36x128xbf16> to vector<36x128xbf16>
    %cst = arith.constant dense<0.000000e+00> : vector<256x128xf32>
    %3 = tpu.matmul %0, %2, %cst {dimension_numbers = #tpu.dot_dimension_numbers<[1], [0], [0], [1], [0, 0, 1, 1], [], []>} : vector<256x36xbf16>, vector<36x128xbf16>, vector<256x128xf32> -> vector<256x128xf32>
    %cst_4 = arith.constant 0.000000e+00 : f32
    %4 = vector.broadcast %cst_4 : f32 to vector<256x128xf32>
    %5 = arith.maximumf %3, %4 : vector<256x128xf32>
    %c0_5 = arith.constant 0 : index
    %c0_6 = arith.constant 0 : index
    %6 = vector.load %arg2[%c0_5, %c0_6] : memref<4x256xf32, #tpu.memory_space<vmem>>, vector<4x256xf32>
    %cst_7 = arith.constant dense<0.000000e+00> : vector<4x128xf32>
    %7 = tpu.matmul %6, %5, %cst_7 {dimension_numbers = #tpu.dot_dimension_numbers<[1], [0], [0], [1], [0, 0, 1, 1], [], []>} : vector<4x256xf32>, vector<256x128xf32>, vector<4x128xf32> -> vector<4x128xf32>
    %c0_8 = arith.constant 0 : index
    %c0_9 = arith.constant 0 : index
    %8 = vector.load %arg3[%c0_8, %c0_9] : memref<4x4xf32, #tpu.memory_space<vmem>>, vector<4x4xf32>
    %c0_10 = arith.constant 0 : index
    %c0_11 = arith.constant 0 : index
    %c0_12 = arith.constant 0 : index
    %9 = vector.load %arg9[%c0_10, %c0_11, %c0_12] : memref<1x8x128xf32, #tpu.memory_space<vmem>>, vector<1x8x128xf32>
    %10 = vector.shape_cast %9 : vector<1x8x128xf32> to vector<8x128xf32>
    %11 = vector.extract_strided_slice %10 {offsets = [0, 0], sizes = [1, 128], strides = [1, 1]} : vector<8x128xf32> to vector<1x128xf32>
    %12 = vector.extract_strided_slice %10 {offsets = [1, 0], sizes = [1, 128], strides = [1, 1]} : vector<8x128xf32> to vector<1x128xf32>
    %13 = vector.extract_strided_slice %10 {offsets = [2, 0], sizes = [1, 128], strides = [1, 1]} : vector<8x128xf32> to vector<1x128xf32>
    %14 = vector.extract_strided_slice %10 {offsets = [3, 0], sizes = [1, 128], strides = [1, 1]} : vector<8x128xf32> to vector<1x128xf32>
    %15 = vector.extract_strided_slice %10 {offsets = [4, 0], sizes = [1, 128], strides = [1, 1]} : vector<8x128xf32> to vector<1x128xf32>
    %16 = arith.truncf %7 : vector<4x128xf32> to vector<4x128xbf16>
    %c0_13 = arith.constant 0 : index
    %c0_14 = arith.constant 0 : index
    %c0_15 = arith.constant 0 : index
    %17 = vector.load %arg5[%c0_13, %c0_14, %c0_15] : memref<1x128x128xbf16, #tpu.memory_space<vmem>>, vector<1x128x128xbf16>
    %18 = vector.shape_cast %17 : vector<1x128x128xbf16> to vector<128x128xbf16>
    %cst_16 = arith.constant dense<0.000000e+00> : vector<4x128xf32>
    %19 = tpu.matmul %16, %18, %cst_16 {dimension_numbers = #tpu.dot_dimension_numbers<[1], [0], [0], [1], [0, 0, 1, 1], [], []>} : vector<4x128xbf16>, vector<128x128xbf16>, vector<4x128xf32> -> vector<4x128xf32>
    %cst_17 = arith.constant dense<0.000000e+00> : vector<4x128xf32>
    %20 = tpu.matmul %8, %19, %cst_17 {dimension_numbers = #tpu.dot_dimension_numbers<[1], [0], [0], [1], [0, 0, 1, 1], [], []>} : vector<4x4xf32>, vector<4x128xf32>, vector<4x128xf32> -> vector<4x128xf32>
    %21 = arith.subf %19, %20 : vector<4x128xf32>
    %22 = arith.mulf %21, %21 : vector<4x128xf32>
    %cst_18 = arith.constant dense<0.000000e+00> : vector<4x128xf32>
    %23 = tpu.matmul %8, %22, %cst_18 {dimension_numbers = #tpu.dot_dimension_numbers<[1], [0], [0], [1], [0, 0, 1, 1], [], []>} : vector<4x4xf32>, vector<4x128xf32>, vector<4x128xf32> -> vector<4x128xf32>
    %cst_19 = arith.constant 9.99999974E-6 : f32
    %24 = vector.broadcast %cst_19 : f32 to vector<4x128xf32>
    %25 = arith.addf %23, %24 : vector<4x128xf32>
    %26 = math.rsqrt %25 : vector<4x128xf32>
    %27 = arith.mulf %21, %26 : vector<4x128xf32>
    %28 = vector.broadcast %11 : vector<1x128xf32> to vector<4x128xf32>
    %29 = arith.mulf %28, %27 : vector<4x128xf32>
    %30 = vector.broadcast %12 : vector<1x128xf32> to vector<4x128xf32>
    %31 = arith.addf %29, %30 : vector<4x128xf32>
    %cst_20 = arith.constant 0.000000e+00 : f32
    %32 = vector.broadcast %cst_20 : f32 to vector<4x128xf32>
    %33 = arith.maximumf %31, %32 : vector<4x128xf32>
    %34 = arith.truncf %33 : vector<4x128xf32> to vector<4x128xbf16>
    %c0_21 = arith.constant 0 : index
    %c0_22 = arith.constant 0 : index
    %c0_23 = arith.constant 0 : index
    %35 = vector.load %arg6[%c0_21, %c0_22, %c0_23] : memref<1x128x128xbf16, #tpu.memory_space<vmem>>, vector<1x128x128xbf16>
    %36 = vector.shape_cast %35 : vector<1x128x128xbf16> to vector<128x128xbf16>
    %cst_24 = arith.constant dense<0.000000e+00> : vector<4x128xf32>
    %37 = tpu.matmul %34, %36, %cst_24 {dimension_numbers = #tpu.dot_dimension_numbers<[1], [0], [0], [1], [0, 0, 1, 1], [], []>} : vector<4x128xbf16>, vector<128x128xbf16>, vector<4x128xf32> -> vector<4x128xf32>
    %cst_25 = arith.constant dense<0.000000e+00> : vector<4x128xf32>
    %38 = tpu.matmul %8, %37, %cst_25 {dimension_numbers = #tpu.dot_dimension_numbers<[1], [0], [0], [1], [0, 0, 1, 1], [], []>} : vector<4x4xf32>, vector<4x128xf32>, vector<4x128xf32> -> vector<4x128xf32>
    %39 = arith.subf %37, %38 : vector<4x128xf32>
    %40 = arith.mulf %39, %39 : vector<4x128xf32>
    %cst_26 = arith.constant dense<0.000000e+00> : vector<4x128xf32>
    %41 = tpu.matmul %8, %40, %cst_26 {dimension_numbers = #tpu.dot_dimension_numbers<[1], [0], [0], [1], [0, 0, 1, 1], [], []>} : vector<4x4xf32>, vector<4x128xf32>, vector<4x128xf32> -> vector<4x128xf32>
    %cst_27 = arith.constant 9.99999974E-6 : f32
    %42 = vector.broadcast %cst_27 : f32 to vector<4x128xf32>
    %43 = arith.addf %41, %42 : vector<4x128xf32>
    %44 = math.rsqrt %43 : vector<4x128xf32>
    %45 = arith.mulf %39, %44 : vector<4x128xf32>
    %46 = vector.broadcast %13 : vector<1x128xf32> to vector<4x128xf32>
    %47 = arith.mulf %46, %45 : vector<4x128xf32>
    %48 = vector.broadcast %14 : vector<1x128xf32> to vector<4x128xf32>
    %49 = arith.addf %47, %48 : vector<4x128xf32>
    %cst_28 = arith.constant 0.000000e+00 : f32
    %50 = vector.broadcast %cst_28 : f32 to vector<4x128xf32>
    %51 = arith.maximumf %49, %50 : vector<4x128xf32>
    %52 = arith.truncf %51 : vector<4x128xf32> to vector<4x128xbf16>
    %c0_29 = arith.constant 0 : index
    %c0_30 = arith.constant 0 : index
    %c0_31 = arith.constant 0 : index
    %53 = vector.load %arg7[%c0_29, %c0_30, %c0_31] : memref<1x128x128xbf16, #tpu.memory_space<vmem>>, vector<1x128x128xbf16>
    %54 = vector.shape_cast %53 : vector<1x128x128xbf16> to vector<128x128xbf16>
    %cst_32 = arith.constant dense<0.000000e+00> : vector<4x128xf32>
    %55 = tpu.matmul %52, %54, %cst_32 {dimension_numbers = #tpu.dot_dimension_numbers<[1], [0], [0], [1], [0, 0, 1, 1], [], []>} : vector<4x128xbf16>, vector<128x128xbf16>, vector<4x128xf32> -> vector<4x128xf32>
    %56 = vector.broadcast %15 : vector<1x128xf32> to vector<4x128xf32>
    %57 = arith.addf %55, %56 : vector<4x128xf32>
    %58 = arith.mulf %57, %57 : vector<4x128xf32>
    %cst_33 = arith.constant dense<0.000000e+00> : vector<4xf32>
    %59 = vector.multi_reduction <add>, %58, %cst_33 [1] : vector<4x128xf32> to vector<4xf32>
    %60 = vector.shape_cast %59 : vector<4xf32> to vector<4x1xf32>
    %cst_34 = arith.constant 1.000000e-24 : f32
    %61 = vector.broadcast %cst_34 : f32 to vector<4x1xf32>
    %62 = arith.maximumf %60, %61 : vector<4x1xf32>
    %63 = math.rsqrt %62 : vector<4x1xf32>
    %64 = vector.broadcast %63 : vector<4x1xf32> to vector<4x128xf32>
    %65 = arith.mulf %57, %64 : vector<4x128xf32>
    %66 = arith.truncf %65 : vector<4x128xf32> to vector<4x128xbf16>
    %c0_35 = arith.constant 0 : index
    %c0_36 = arith.constant 0 : index
    %c0_37 = arith.constant 0 : index
    %67 = vector.load %arg8[%c0_35, %c0_36, %c0_37] : memref<1x128x128xbf16, #tpu.memory_space<vmem>>, vector<1x128x128xbf16>
    %68 = vector.shape_cast %67 : vector<1x128x128xbf16> to vector<128x128xbf16>
    %cst_38 = arith.constant dense<0.000000e+00> : vector<4x128xf32>
    %69 = tpu.matmul %66, %68, %cst_38 {dimension_numbers = #tpu.dot_dimension_numbers<[1], [0], [0], [1], [0, 0, 1, 1], [], []>} : vector<4x128xbf16>, vector<128x128xbf16>, vector<4x128xf32> -> vector<4x128xf32>
    %c0_39 = arith.constant 0 : index
    %c0_40 = arith.constant 0 : index
    %c0_41 = arith.constant 0 : index
    %70 = vector.load %arg10[%c0_39, %c0_40, %c0_41] : memref<1x4x128xf32, #tpu.memory_space<vmem>>, vector<1x4x128xf32>
    %71 = vector.shape_cast %70 : vector<1x4x128xf32> to vector<4x128xf32>
    %72 = vector.shape_cast %69 : vector<4x128xf32> to vector<1x4x128xf32>
    tpu.vector_store %arg10[%c0_39, %c0_40, %c0_41], %72 {strides = array<i32>} : memref<1x4x128xf32, #tpu.memory_space<vmem>>, vector<1x4x128xf32>,
    return
  }
  func.func @transform_0(%arg0: i32) -> (i32, i32) {
    %c0_i32 = arith.constant 0 : i32
    %c0_i32_0 = arith.constant 0 : i32
    %c0_i32_1 = arith.constant 0 : i32
    return %c0_i32, %c0_i32_0 : i32, i32
  }
  func.func @transform_1(%arg0: i32) -> (i32, i32) {
    %c0_i32 = arith.constant 0 : i32
    %c0_i32_0 = arith.constant 0 : i32
    %c0_i32_1 = arith.constant 0 : i32
    return %c0_i32, %c0_i32_0 : i32, i32
  }
  func.func @transform_2(%arg0: i32) -> (i32, i32) {
    %c0_i32 = arith.constant 0 : i32
    %c0_i32_0 = arith.constant 0 : i32
    %c0_i32_1 = arith.constant 0 : i32
    return %c0_i32, %c0_i32_0 : i32, i32
  }
  func.func @transform_3(%arg0: i32) -> (i32, i32, i32) {
    %c0_i32 = arith.constant 0 : i32
    %c0_i32_0 = arith.constant 0 : i32
    %c0_i32_1 = arith.constant 0 : i32
    return %arg0, %c0_i32, %c0_i32_0 : i32, i32, i32
  }
  func.func @transform_4(%arg0: i32) -> (i32, i32, i32) {
    %c0_i32 = arith.constant 0 : i32
    %c0_i32_0 = arith.constant 0 : i32
    %c0_i32_1 = arith.constant 0 : i32
    return %arg0, %c0_i32, %c0_i32_0 : i32, i32, i32
  }
  func.func @transform_5(%arg0: i32) -> (i32, i32, i32) {
    %c0_i32 = arith.constant 0 : i32
    %c0_i32_0 = arith.constant 0 : i32
    %c0_i32_1 = arith.constant 0 : i32
    return %arg0, %c0_i32, %c0_i32_0 : i32, i32, i32
  }
  func.func @transform_6(%arg0: i32) -> (i32, i32, i32) {
    %c0_i32 = arith.constant 0 : i32
    %c0_i32_0 = arith.constant 0 : i32
    %c0_i32_1 = arith.constant 0 : i32
    return %arg0, %c0_i32, %c0_i32_0 : i32, i32, i32
  }
  func.func @transform_7(%arg0: i32) -> (i32, i32, i32) {
    %c0_i32 = arith.constant 0 : i32
    %c0_i32_0 = arith.constant 0 : i32
    %c0_i32_1 = arith.constant 0 : i32
    return %arg0, %c0_i32, %c0_i32_0 : i32, i32, i32
  }
  func.func @transform_8(%arg0: i32) -> (i32, i32, i32) {
    %c0_i32 = arith.constant 0 : i32
    %c0_i32_0 = arith.constant 0 : i32
    %c0_i32_1 = arith.constant 0 : i32
    return %arg0, %c0_i32, %c0_i32_0 : i32, i32, i32
  }
  func.func @transform_9(%arg0: i32) -> (i32, i32, i32) {
    %c0_i32 = arith.constant 0 : i32
    %c0_i32_0 = arith.constant 0 : i32
    %c0_i32_1 = arith.constant 0 : i32
    return %arg0, %c0_i32, %c0_i32_0 : i32, i32, i32
  }
}

</mosaic_0001>

<bundles_post_ra>
// kernel: _forward_impl.1
= control target key start
LH: loop header
LB: loop body
LE: loop exit
PB: predicated region body
PF: predicated region fallthrough
CT: control target
= control target key end

     0   :  { %s2688_s0 = inlined_call_operand.vmem [shape: bf16[256,36], index: 0, kind: input, shape index: {}]   ;;  %s2689_s1 = inlined_call_operand.vmem [shape: f32[4,256], index: 1, kind: input, shape index: {}]   ;;  %s2690_s2 = inlined_call_operand.vmem [shape: f32[4,4], index: 2, kind: input, shape index: {}]   ;;  %s2691_s3 = inlined_call_operand.vmem [shape: bf16[2,36,128], index: 3, kind: input, shape index: {}]   ;;  %s2692_s4 = inlined_call_operand.vmem [shape: bf16[2,128,128], index: 4, kind: input, shape index: {}]   ;;  %s2693_s5 = inlined_call_operand.vmem [shape: bf16[2,128,128], index: 5, kind: input, shape index: {}]   ;;  %s2694_s6 = inlined_call_operand.vmem [shape: bf16[2,128,128], index: 6, kind: input, shape index: {}]   ;;  %s2695_s7 = inlined_call_operand.vmem [shape: bf16[2,128,128], index: 7, kind: input, shape index: {}]   ;;  %s2696_s8 = inlined_call_operand.vmem [shape: f32[2,8,128], index: 8, kind: input, shape index: {}]   ;;  %s2697_s9 = inlined_call_operand.hbm [shape: f32[2,4,128], index: 9, kind: output, shape index: {}]  }
   0x1   :  { %2698 = sst [smem:[#allocation6_spill]] %s2691_s3 }
   0x2   :  { %2699 = sst [smem:[#allocation7_spill]] %s2692_s4 }
   0x3   :  { %2700 = sst [smem:[#allocation8_spill]] %s2693_s5 }
   0x4   :  { %14 = vsyncpa [#allocation3], 0 }
   0x5   :  { %16 = vsyncpa [#allocation3 + $0x1], 0  ;;  %s2366_s30 = smov 0   ;;  %s2368_s10 = smov 0  }
   0x6   :  { %s2370_s11 = smov 0   ;;  %s2372_s12 = smov 0  }
   0x7 LB: > { %s2387_s13 = sadd.s32 4294967295, %s2311_s12   ;;  %s1775_s14 = sadd.s32 4294967294, %s2311_s12   ;;  %s2311_s12 = sphi %s2372_s12, %s2711_s12   ;;  %s2307_s11 = sphi %s2370_s11, %s2710_s11   ;;  %s2303_s10 = sphi %s2368_s10, %s2709_s10   ;;  %s2299_s30 = sphi %s2366_s30, %s2708_s30  }
   0x8   : > { %s2391_s15 = sadd.s32 1, %s2311_s12   ;;  %s248_s16 = sadd.s32 1, %s2307_s11 }
   0x9   : > { %s245_s17 = ssub.s32 %s2311_s12, %s2391_s15  ;;  %p258_p0 = scmp.ne.s32.totalorder %s2307_s11, %s2303_s10 }
   0xa   : > { %p246_p1 = scmp.eq.s32.totalorder %s245_s17, 0  ;;  %p259_p2 = scmp.eq.s32.totalorder %s2387_s13, 1 }
   0xb   : > { %p264_p3 = scmp.ne.s32.totalorder %s2303_s10, %s2299_s30  ;;  %p265_p4 = scmp.eq.s32.totalorder %s1775_s14, 1 }
   0xc   : > { %s2402_s18 = scalar_select %p246_p1, %s2307_s11, %s248_s16  }
   0xd   : > { %p2404_p5 = por %p259_p2, %p258_p0  ;;  %p2408_p6 = por %p265_p4, %p264_p3 }
   0xe   : > { %2701 = sst [smem:[#allocation5_spill]] %s2402_s18  ;;  %p1778_p7 = scmp.ge.s32.totalorder %s2311_s12, 1 }
   0xf   : > { %p339_p8 = scmp.lt.s32.totalorder %s2311_s12, 3 }
  0x11   : > { %p340_p9 = pnand %p1778_p7, %p339_p8 }
  0x12   : > { %p399_p10 = scmp.lt.s32.totalorder (!%p340_p9), %s2387_s13, 1  ;;  %v2194_v0 = vld [vmem:[%s2688_s0] sm:$0xff] (!%p340_p9)   ;;  %vm561_vm0 = vcmask (!%p340_p9), 293888   ;;  %s2704_s3 = sld [smem:[#allocation6_spill]] (!%p340_p9)  ;;  %vm610_vm1 = vcmask (!%p340_p9), 1041408   ;;  %v2196_v6 = vld [vmem:[%s2688_s0 + $0x8] sm:$0xff] (!%p340_p9)  }
  0x13   : > { %343 = sbr.rel (%p340_p9) target bundleno = 2445 (0x98d), region = 56  ;;  %v2195_v1 = vld [vmem:[%s2688_s0 + $0x40] sm:$0xff] (!%p340_p9)   ;;  %1977 = vmatprep.mubr.msk.bf16.mxu0 (!%p340_p9), %vm561_vm0, %v2194_v0  ;;  %v2197_v7 = vld [vmem:[%s2688_s0 + $0x48] sm:$0xff] (!%p340_p9)   ;;  %v2198_v8 = vld [vmem:[%s2688_s0 + $0x10] sm:$0xff] (!%p340_p9)   ;;  %s2705_s4 = sld [smem:[#allocation7_spill]] (!%p340_p9)  ;;  %v2313_v23 = vmov (!%p340_p9), 0.0  }
  0x14   : > { %1993 = vmatprep.mubr.msk.bf16.mxu1 (!%p340_p9), %vm561_vm0, %v2195_v1  ;;  %v2199_v9 = vld [vmem:[%s2688_s0 + $0x50] sm:$0xff] (!%p340_p9)   ;;  %s2706_s5 = sld [smem:[#allocation8_spill]] (!%p340_p9)  ;;  %v2200_v10 = vld [vmem:[%s2688_s0 + $0x18] sm:$0xff] (!%p340_p9)   ;;  %v2202_v12 = vld [vmem:[%s2688_s0 + $0x20] sm:$0xff] (!%p340_p9)   ;;  %vm2314_vm2 = vmmov (!%p340_p9), 0   ;;  %vm992_vm3 = vcmask (!%p340_p9), 1043456  }
  0x15   : > { %v2201_v11 = vld [vmem:[%s2688_s0 + $0x58] sm:$0xff] (!%p340_p9)   ;;  %v2203_v13 = vld [vmem:[%s2688_s0 + $0x60] sm:$0xff] (!%p340_p9)   ;;  %v2204_v14 = vld [vmem:[%s2688_s0 + $0x28] sm:$0xff] (!%p340_p9)   ;;  %vm988_vm4 = vcmask (!%p340_p9), 31744   ;;  %s1866_s24 = sshll.u32 (!%p340_p9), %s2387_s13, 6 }
  0x16   : > { %v2205_v15 = vld [vmem:[%s2688_s0 + $0x68] sm:$0xff] (!%p340_p9)   ;;  %v2206_v16 = vld [vmem:[%s2688_s0 + $0x30] sm:$0xff] (!%p340_p9)   ;;  %v2208_v18 = vld [vmem:[%s2688_s0 + $0x38] sm:$0xff] (!%p340_p9)  }
  0x17   : > { %v2207_v17 = vld [vmem:[%s2688_s0 + $0x70] sm:$0xff] (!%p340_p9)   ;;  %v2209_v19 = vld [vmem:[%s2688_s0 + $0x78] sm:$0xff] (!%p340_p9)   ;;  %v2516_v20 = vld [vmem:[%s2689_s1] sm:$0xff] (!%p340_p9) }
  0x18   : > { %v809_v21 = vcombine.high (!%p340_p9), %v2516_v20, %v2516_v20 }
  0x1a   : > { %s2419_s23 = scalar_select %p399_p10, %s2387_s13, 1 }
  0x1b   : > { %s2315_s13 = smov [#allocation2]  }
  0x1c   : > { %s2149_s26 = smul.u32 20, %s2419_s23  ;;  %s2431_s14 = sshll.u32 %s2419_s23, 6 }
  0x1d   : > { %s2446_s28 = scalar_lea.vmem %s2705_s4, %s2431_s14  ;;  %s2459_s21 = scalar_lea.vmem %s2706_s5, %s2431_s14 }
  0x1e   : > { %s403_s29 = scalar_lea.vmem %s2704_s3, %s2149_s26  ;;  %s2477_s17 = scalar_lea.vmem %s2694_s6, %s2431_s14  ;;  %v2211_v22 = vld [vmem:[%s2446_s28] sm:$0xff]   ;;  %v2212_v24 = vld [vmem:[%s2446_s28 + $0x8] sm:$0xff]   ;;  %v2213_v25 = vld [vmem:[%s2446_s28 + $0x10] sm:$0xff]  }
  0x1f   : > { %v2191_v2 = vld [vmem:[%s403_s29] sm:$0xff]   ;;  %v2192_v3 = vld [vmem:[%s403_s29 + $0x8] sm:$0xff]   ;;  %v2193_v4 = vld [vmem:[%s403_s29 + $0x10] ss:$0 sps:$4 sm:$0x33]   ;;  %s2499_s5 = scalar_lea.vmem %s2695_s7, %s2431_s14  ;;  %s1789_s26 = sshll.u32 %s2419_s23, 3 }
  0x20   : > { %1971 = vmatprep.subr.bf16.mxu0 %v2191_v2  ;;  %2141 = vmatprep.subr.bf16.mxu1 %v2191_v2  ;;  %v612_v5 = vsel %vm610_vm1, %v2193_v4, 0  ;;  %v2214_v26 = vld [vmem:[%s2446_s28 + $0x18] sm:$0xff]   ;;  %v2215_v27 = vld [vmem:[%s2446_s28 + $0x20] sm:$0xff]   ;;  %v2216_v28 = vld [vmem:[%s2446_s28 + $0x28] sm:$0xff]   ;;  %s427_s16 = scalar_lea.vmem %s2696_s8, %s1789_s26  ;;  %s396_s23 = sand.u32 1, %s2303_s10  }
  0x21   : > { %1972 = vmatpush3.bf16.msra.mxu0 %v2191_v2  ;;  %2144 = vmatpush3.bf16.msra.mxu1 %v2191_v2  ;;  %v2217_v29 = vld [vmem:[%s2446_s28 + $0x30] sm:$0xff]   ;;  %s2648_s4 = scalar_lea.hbm %s2697_s9, %s1866_s24  ;;  %s1643_s14 = scalar_lea.sflag [#allocation3], %s396_s23 }
  0x22   : > { %1973 = vmatprep.subr.bf16.mxu0 %v2192_v3  ;;  %2142 = vmatprep.subr.bf16.mxu1 %v2192_v3 }
  0x25   : > { %1974 = vmatpush3.bf16.msra.mxu0 %v2192_v3  ;;  %2145 = vmatpush3.bf16.msra.mxu1 %v2192_v3 }
  0x26   : > { %2147 = vmatprep.subr.msk.bf16.mxu0 %vm610_vm1, %v2193_v4  ;;  %2148 = vmatprep.subr.msk.bf16.mxu1 %vm610_vm1, %v2193_v4 }
  0x29   : > { %1976 = vmatpush3.bf16.msra.mxu0 %v612_v5  ;;  %2146 = vmatpush3.bf16.msra.mxu1 %v612_v5 }
  0x2a   : > { %2009 = vmatprep.subr.bf16.mxu1 %v2313_v23 }
  0x2c   : > { %1978 = vmatmul.mubr.msk.bf16.vlgmr.msra.gmra.mrb[0].mxu0 %vm561_vm0, %v2196_v6  ;;  %1994 = vmatmul.mubr.msk.bf16.vlgmr.msra.gmra.mrb[0].mxu1 %vm561_vm0, %v2197_v7 }
  0x2d   : > { %1981 = vmatprep.mubr.msk.bf16.mxu0 %vm561_vm0, %v2198_v8  ;;  %1997 = vmatprep.mubr.msk.bf16.mxu1 %vm561_vm0, %v2199_v9 }
  0x2e   : > { %2010 = vmatpush3.bf16.msra.mxu1 %v2211_v22 }
  0x2f   : > { %2011 = vmatprep.subr.bf16.mxu1 %v2313_v23 }
  0x32   : > { %2012 = vmatpush3.bf16.msra.mxu1 %v2212_v24 }
  0x33   : > { %2013 = vmatprep.subr.bf16.mxu1 %v2313_v23 }
  0x34   : > { %1982 = vmatmul.mubr.msk.bf16.gmra.mrb[4].mxu0 %vm561_vm0, %v2200_v10  ;;  %1998 = vmatmul.mubr.msk.bf16.gmra.mrb[4].mxu1 %vm561_vm0, %v2201_v11 }
  0x35   : > { %1985 = vmatprep.mubr.msk.bf16.mxu0 %vm561_vm0, %v2202_v12  ;;  %2001 = vmatprep.mubr.msk.bf16.mxu1 %vm561_vm0, %v2203_v13 }
  0x36   : > { %2014 = vmatpush3.bf16.msra.mxu1 %v2213_v25 }
  0x37   : > { %2015 = vmatprep.subr.bf16.mxu1 %v2313_v23 }
  0x3a   : > { %2016 = vmatpush3.bf16.msra.mxu1 %v2214_v26 }
  0x3b   : > { %2017 = vmatprep.subr.bf16.mxu1 %v2313_v23 }
  0x3c   : > { %1986 = vmatmul.mubr.msk.bf16.gmra.mrb[8].mxu0 %vm561_vm0, %v2204_v14  ;;  %2002 = vmatmul.mubr.msk.bf16.gmra.mrb[8].mxu1 %vm561_vm0, %v2205_v15 }
  0x3d   : > { %1989 = vmatprep.mubr.msk.bf16.mxu0 %vm561_vm0, %v2206_v16  ;;  %2005 = vmatprep.mubr.msk.bf16.mxu1 %vm561_vm0, %v2207_v17 }
  0x3e   : > { %2018 = vmatpush3.bf16.msra.mxu1 %v2215_v27 }
  0x3f   : > { %2019 = vmatprep.subr.bf16.mxu1 %v2313_v23 }
  0x42   : > { %2020 = vmatpush3.bf16.msra.mxu1 %v2216_v28 }
  0x43   : > { %2021 = vmatprep.subr.bf16.mxu1 %v2313_v23 }
  0x44   : > { %1990 = vmatmul.mubr.msk.bf16.gmra.mrb[12].mxu0 %vm561_vm0, %v2208_v18  ;;  %2006 = vmatmul.mubr.msk.bf16.gmra.mrb[12].mxu1 %vm561_vm0, %v2209_v19 }
  0x45   : > { %875 = vmatprep.mubr.f32.mxu0 %v809_v21  ;;  %2025 = vmatprep.mubr.msk.bf16.mxu1 %vm2314_vm2, %v2313_v23 }
  0x46   : > { %2022 = vmatpush3.bf16.msra.mxu1 %v2217_v29 }
  0x47   : > { %2023 = vmatprep.subr.bf16.mxu1 %v2313_v23 }
  0xff   : > { %v1979_v30 = vpop.f32.mrb[0].mxu0  ;;  %v1995_v31 = vpop.f32.mrb[0].mxu1 }
 0x100   : > { %v777_v32 = vmax.f32 %v1979_v30, 0.0  ;;  %v648_v33 = vpop.f32.mrb[1].mxu0  ;;  %v712_v34 = vpop.f32.mrb[1].mxu1  ;;  %v793_v37 = vmax.f32 %v1995_v31, 0.0 }
 0x101   : > { %v1980_v35 = vpop.f32.mrb[2].mxu0  ;;  %v1996_v36 = vpop.f32.mrb[2].mxu1  ;;  %v775_v42 = vmax.f32 %v648_v33, 0.0  ;;  %v791_v43 = vmax.f32 %v712_v34, 0.0 }
 0x102   : > { %v778_v38 = vmax.f32 %v1980_v35, 0.0  ;;  %v794_v39 = vmax.f32 %v1996_v36, 0.0  ;;  %v651_v40 = vpop.f32.mrb[3].mxu0  ;;  %v715_v41 = vpop.f32.mrb[3].mxu1 }
 0x103   : > { %v776_v44 = vmax.f32 %v651_v40, 0.0  ;;  %v792_v45 = vmax.f32 %v715_v41, 0.0 }
 0x104   : > { %v2115_v46 = vpack.c.bf16 %v778_v38, %v777_v32  ;;  %v2113_v47 = vpack.c.bf16 %v794_v39, %v793_v37 }
 0x105   : > { %v2111_v48 = vpack.c.bf16 %v776_v44, %v775_v42  ;;  %v2109_v49 = vpack.c.bf16 %v792_v45, %v791_v43 }
 0x107   : > { %v1983_v50 = vpop.f32.mrb[4].mxu0  ;;  %v1999_v51 = vpop.f32.mrb[4].mxu1  ;;  %2110 = vmatprep.subr.bf16.mxu0 %v2109_v49 }
 0x108   : > { %v781_v52 = vmax.f32 %v1983_v50, 0.0  ;;  %v664_v53 = vpop.f32.mrb[5].mxu0  ;;  %v728_v54 = vpop.f32.mrb[5].mxu1  ;;  %2112 = vmatpush3.bf16.msra.mxu0 %v2111_v48  ;;  %v797_v57 = vmax.f32 %v1999_v51, 0.0  ;;  %v2218_v48 = vld [vmem:[%s2446_s28 + $0x38] sm:$0xff]   ;;  %s2253_s28 = sshll.u32 %s2315_s13, 4  ;;  %s2254_s28 = int_to_ptr.vmem [resolvable:$false] %s2253_s28 }
 0x109   : > { %v1984_v55 = vpop.f32.mrb[6].mxu0  ;;  %v2000_v56 = vpop.f32.mrb[6].mxu1  ;;  %2114 = vmatprep.subr.bf16.mxu0 %v2113_v47  ;;  %v779_v62 = vmax.f32 %v664_v53, 0.0  ;;  %v795_v63 = vmax.f32 %v728_v54, 0.0  ;;  %2024 = vmatpush3.bf16.msra.mxu1 %v2218_v48  ;;  %s2255_s25 = scalar_lea.vmem %s2254_s28, 128 }
 0x10a   : > { %v782_v58 = vmax.f32 %v1984_v55, 0.0  ;;  %v798_v59 = vmax.f32 %v2000_v56, 0.0  ;;  %v667_v60 = vpop.f32.mrb[7].mxu0  ;;  %v731_v61 = vpop.f32.mrb[7].mxu1  ;;  %2039 = vmatprep.subr.bf16.mxu1 %v2313_v23 }
 0x10b   : > { %v780_v0 = vmax.f32 %v667_v60, 0.0  ;;  %v796_v1 = vmax.f32 %v731_v61, 0.0 }
 0x10c   : > { %v2123_v2 = vpack.c.bf16 %v782_v58, %v781_v52  ;;  %v2121_v3 = vpack.c.bf16 %v798_v59, %v797_v57  ;;  %2116 = vmatpush3.bf16.msra.mxu0 %v2115_v46  ;;  %v2219_v57 = vld [vmem:[%s2459_s21] sm:$0xff]   ;;  %v2220_v58 = vld [vmem:[%s2459_s21 + $0x8] sm:$0xff]  }
 0x10d   : > { %v2119_v4 = vpack.c.bf16 %v780_v0, %v779_v62  ;;  %v2117_v5 = vpack.c.bf16 %v796_v1, %v795_v63  ;;  %v2221_v63 = vld [vmem:[%s2459_s21 + $0x10] sm:$0xff]   ;;  %v2222_v0 = vld [vmem:[%s2459_s21 + $0x18] sm:$0xff]   ;;  %v2223_v1 = vld [vmem:[%s2459_s21 + $0x20] sm:$0xff]  }
 0x10f   : > { %v1987_v6 = vpop.f32.mrb[8].mxu0  ;;  %v2003_v7 = vpop.f32.mrb[8].mxu1  ;;  %2118 = vmatprep.subr.bf16.mxu0 %v2117_v5 }
 0x110   : > { %v785_v8 = vmax.f32 %v1987_v6, 0.0  ;;  %v680_v9 = vpop.f32.mrb[9].mxu0  ;;  %v744_v10 = vpop.f32.mrb[9].mxu1  ;;  %2120 = vmatpush3.bf16.msra.mxu0 %v2119_v4  ;;  %v801_v13 = vmax.f32 %v2003_v7, 0.0  ;;  %v2226_v4 = vld [vmem:[%s2459_s21 + $0x38] sm:$0xff]   ;;  %v1143_v6 = vlaneseq }
 0x111   : > { %v1988_v11 = vpop.f32.mrb[10].mxu0  ;;  %v2004_v12 = vpop.f32.mrb[10].mxu1  ;;  %2122 = vmatprep.subr.bf16.mxu0 %v2121_v3  ;;  %v783_v18 = vmax.f32 %v680_v9, 0.0  ;;  %v799_v19 = vmax.f32 %v744_v10, 0.0  ;;  %v2225_v3 = vld [vmem:[%s2459_s21 + $0x30] sm:$0xff]  }
 0x112   : > { %v786_v14 = vmax.f32 %v1988_v11, 0.0  ;;  %v802_v15 = vmax.f32 %v2004_v12, 0.0  ;;  %v683_v16 = vpop.f32.mrb[11].mxu0  ;;  %v747_v17 = vpop.f32.mrb[11].mxu1  ;;  %v2579_v9 = vshrl.u32 %v1143_v6, 7  ;;  %v2585_v11 = vld [vmem:[%s427_s16] sm:$0xff] }
 0x113   : > { %v784_v21 = vmax.f32 %v683_v16, 0.0  ;;  %v800_v22 = vmax.f32 %v747_v17, 0.0 }
 0x114   : > { %v2131_v24 = vpack.c.bf16 %v786_v14, %v785_v8  ;;  %v2129_v25 = vpack.c.bf16 %v802_v15, %v801_v13  ;;  %2124 = vmatpush3.bf16.msra.mxu0 %v2123_v2  ;;  %v2224_v2 = vld [vmem:[%s2459_s21 + $0x28] sm:$0xff]   ;;  %v1145_v10 = vsub.s32 0, %v2579_v9  ;;  %v1150_v12 = vsub.s32 1, %v2579_v9  ;;  %s1779_s21 = sshll.u32 %s396_s23, 2 }
 0x115   : > { %v2127_v26 = vpack.c.bf16 %v784_v21, %v783_v18  ;;  %v2125_v27 = vpack.c.bf16 %v800_v22, %v799_v19 }
 0x116   : > { %v1146_v13 = vrot.slane %v2585_v11, %v1145_v10  ;;  %v1151_v16 = vrot.slane %v2585_v11, %v1150_v12 }
 0x117   : > { %v1991_v28 = vpop.f32.mrb[12].mxu0  ;;  %v2007_v29 = vpop.f32.mrb[12].mxu1  ;;  %2126 = vmatprep.subr.bf16.mxu0 %v2125_v27 }
 0x118   : > { %v789_v30 = vmax.f32 %v1991_v28, 0.0  ;;  %v696_v31 = vpop.f32.mrb[13].mxu0  ;;  %v760_v32 = vpop.f32.mrb[13].mxu1  ;;  %2128 = vmatpush3.bf16.msra.mxu0 %v2127_v26  ;;  %v805_v35 = vmax.f32 %v2007_v29, 0.0 }
 0x119   : > { %v1992_v33 = vpop.f32.mrb[14].mxu0  ;;  %v2008_v34 = vpop.f32.mrb[14].mxu1  ;;  %2130 = vmatprep.subr.bf16.mxu0 %v2129_v25  ;;  %v787_v40 = vmax.f32 %v696_v31, 0.0  ;;  %v803_v41 = vmax.f32 %v760_v32, 0.0  ;;  %v2227_v31 = vld [vmem:[%s2477_s17] sm:$0xff]   ;;  %v2228_v32 = vld [vmem:[%s2477_s17 + $0x8] sm:$0xff]  }
 0x11a   : > { %v790_v36 = vmax.f32 %v1992_v33, 0.0  ;;  %v806_v37 = vmax.f32 %v2008_v34, 0.0  ;;  %v699_v38 = vpop.f32.mrb[15].mxu0  ;;  %v763_v39 = vpop.f32.mrb[15].mxu1  ;;  %v2229_v33 = vld [vmem:[%s2477_s17 + $0x10] sm:$0xff]   ;;  %v2230_v34 = vld [vmem:[%s2477_s17 + $0x18] sm:$0xff]  }
 0x11b   : > { %v788_v42 = vmax.f32 %v699_v38, 0.0  ;;  %v804_v43 = vmax.f32 %v763_v39, 0.0  ;;  %v2234_v38 = vld [vmem:[%s2477_s17 + $0x38] sm:$0xff]  }
 0x11c   : > { %v2139_v44 = vpack.c.bf16 %v790_v36, %v789_v30  ;;  %v2137_v45 = vpack.c.bf16 %v806_v37, %v805_v35  ;;  %2132 = vmatpush3.bf16.msra.mxu0 %v2131_v24  ;;  %v2231_v35 = vld [vmem:[%s2477_s17 + $0x20] sm:$0xff]   ;;  %v2232_v36 = vld [vmem:[%s2477_s17 + $0x28] sm:$0xff]   ;;  %v2233_v37 = vld [vmem:[%s2477_s17 + $0x30] sm:$0xff]   ;;  %s398_s17 = scalar_lea.vmem [#allocation2], %s1779_s21 }
 0x11d   : > { %v2135_v46 = vpack.c.bf16 %v788_v42, %v787_v40  ;;  %v2133_v47 = vpack.c.bf16 %v804_v43, %v803_v41  ;;  %v1411_v42 = vsub.s32 2, %v2579_v9  ;;  %v1416_v43 = vsub.s32 3, %v2579_v9  ;;  %s1656_s22 = sshll.u32 %s398_s17, 4  ;;  %s2643_s22 = int_to_ptr.vmem [resolvable:$true] %s1656_s22 }
 0x11e   : > { %s2249_s18 = scalar_lea.vmem %s2643_s22, 64  ;;  %p2256_p0 = scmp.lt.s32.totalorder %s2643_s22, %s2254_s28 }
 0x11f   : > { %2134 = vmatprep.subr.bf16.mxu0 %v2133_v47  ;;  %v1417_v47 = vrot.slane %v2585_v11, %v1416_v43  ;;  %p2250_p11 = scmp.ne.s32.totalorder %s2643_s22, %s2249_s18  ;;  %p2257_p1 = scmp.lt.s32.totalorder %s2255_s25, %s2249_s18 }
 0x120   : > { %2136 = vmatpush3.bf16.msra.mxu0 %v2135_v46 }
 0x121   : > { %2138 = vmatprep.subr.bf16.mxu0 %v2137_v45  ;;  %p2251_p12 = pnand %p2250_p11, %p2404_p5  ;;  %p2258_p2 = por %p2257_p1, %p2256_p0 }
 0x123   : > { %p2252_p13 = pneg %p2251_p12 }
 0x124   : > { %2140 = vmatpush3.bf16.msra.mxu0 %v2139_v44  ;;  %v1412_v44 = vrot.slane %v2585_v11, %v1411_v42 }
 0x125   : > { %2029 = vmatprep.subr.mxu0 %v2313_v23  ;;  %p2259_p3 = pnand %p2258_p2, %p2252_p13 }
 0x127   : > { %876 = vmatmul.mubr.f32.vlgmr.msra.gmra.mrb[16].mxu0 %v2516_v20  ;;  %v2548_v20 = vld [vmem:[%s2690_s2] sm:$0xf] }
 0x128   : > { %2031 = vmatprep.mubr.msk.f32.mxu0 %vm2314_vm2, %v2313_v23 }
 0x1fa   : > { %v1924_v49 = vpop.f32.mrb[16].mxu0 }
 0x1fb   : > { %v1925_v50 = vpop.f32.mrb[17].mxu0 }
 0x1fc   : > { %v1926_v51 = vadd.f32 %v1925_v50, %v1924_v49 }
 0x1fe   : > { %v883_v52 = vpack.c.bf16 %v1926_v51, %v1926_v51 }
 0x200   : > { %2026 = vmatmul.mubr.bf16.vlgmr.msra.gmra.mrb[16].mxu1 %v883_v52  ;;  %v2235_v52 = vld [vmem:[%s2499_s5] sm:$0xff]  }
 0x201   : > { %2055 = vmatprep.mubr.msk.bf16.mxu1 %vm2314_vm2, %v2313_v23  ;;  %2040 = vmatpush3.bf16.msra.mxu1 %v2219_v57 }
 0x202   : > { %2041 = vmatprep.subr.bf16.mxu1 %v2313_v23 }
 0x205   : > { %2042 = vmatpush3.bf16.msra.mxu1 %v2220_v58 }
 0x206   : > { %2043 = vmatprep.subr.bf16.mxu1 %v2313_v23 }
 0x209   : > { %2044 = vmatpush3.bf16.msra.mxu1 %v2221_v63 }
 0x20a   : > { %2045 = vmatprep.subr.bf16.mxu1 %v2313_v23 }
 0x20d   : > { %2046 = vmatpush3.bf16.msra.mxu1 %v2222_v0  ;;  %v2239_v0 = vld [vmem:[%s2499_s5 + $0x20] sm:$0xff]  }
 0x20e   : > { %2047 = vmatprep.subr.bf16.mxu1 %v2313_v23 }
 0x211   : > { %2048 = vmatpush3.bf16.msra.mxu1 %v2223_v1  ;;  %v2240_v1 = vld [vmem:[%s2499_s5 + $0x28] sm:$0xff]  }
 0x212   : > { %2049 = vmatprep.subr.bf16.mxu1 %v2313_v23 }
 0x215   : > { %2050 = vmatpush3.bf16.msra.mxu1 %v2224_v2  ;;  %v2241_v2 = vld [vmem:[%s2499_s5 + $0x30] sm:$0xff]  }
 0x216   : > { %2051 = vmatprep.subr.bf16.mxu1 %v2313_v23 }
 0x219   : > { %2052 = vmatpush3.bf16.msra.mxu1 %v2225_v3  ;;  %v2242_v3 = vld [vmem:[%s2499_s5 + $0x38] sm:$0xff]  }
 0x21a   : > { %2053 = vmatprep.subr.bf16.mxu1 %v2313_v23 }
 0x21d   : > { %2054 = vmatpush3.bf16.msra.mxu1 %v2226_v4 }
 0x21e   : > { %2089 = vmatprep.subr.bf16.mxu1 %v2313_v23 }
 0x2d3   : > { %v982_v53 = vpop.f32.mrb[16].mxu1 }
 0x2d4   : > { %v2027_v54 = vpop.f32.mrb[17].mxu1  ;;  %2030 = vmatpush3.msk.msra.mxu0 %vm992_vm3, %v982_v53 }
 0x2d5   : > { %v985_v55 = vpop.f32.mrb[18].mxu1  ;;  %2032 = vmatmul.mubr.msk.f32.vlgmr.msra.gmra.mrb[18].mxu0 %vm988_vm4, %v2548_v20  ;;  %2034 = vmatprep.subr.mxu0 %v2313_v23  ;;  %v2238_v54 = vld [vmem:[%s2499_s5 + $0x18] sm:$0xff]  }
 0x2d6   : > { %v2028_v56 = vpop.f32.mrb[19].mxu1  ;;  %2036 = vmatprep.mubr.msk.f32.mxu0 %vm2314_vm2, %v2313_v23  ;;  %v1439_v55 = vsub.s32 4, %v2579_v9 }
 0x2d8   : > { %v1440_v56 = vrot.slane %v2585_v11, %v1439_v55 }
 0x3a8   : > { %v1062_v59 = vpop.f32.mrb[18].mxu0 }
 0x3a9   : > { %v1066_v60 = vsub.f32 %v982_v53, %v1062_v59  ;;  %v2033_v61 = vpop.f32.mrb[19].mxu0  ;;  %v2237_v53 = vld [vmem:[%s2499_s5 + $0x10] sm:$0xff]  }
 0x3ab   : > { %v1067_v62 = vmul.f32 %v1066_v60, %v1066_v60 }
 0x3ad   : > { %2035 = vmatpush3.msk.msra.mxu0 %vm992_vm3, %v1067_v62 }
 0x3ae   : > { %2037 = vmatmul.mubr.msk.f32.vlgmr.msra.gmra.mrb[20].mxu0 %vm988_vm4, %v2548_v20  ;;  %2059 = vmatprep.subr.mxu0 %v2313_v23 }
 0x3af   : > { %2061 = vmatprep.mubr.msk.f32.mxu0 %vm2314_vm2, %v2313_v23 }
 0x481   : > { %v1137_v5 = vpop.f32.mrb[20].mxu0 }
 0x482   : > { %v1138_v7 = vadd.f32 1e-05, %v1137_v5  ;;  %v2038_v8 = vpop.f32.mrb[21].mxu0 }
 0x484   : > { %2243 = vrsqrt.f32 %v1138_v7 }
 0x48e   : > { %v2244_v14 = vpop.eup %2243 }
 0x48f   : > { %v1142_v15 = vmul.f32 %v2244_v14, %v1066_v60 }
 0x491   : > { %v1147_v17 = vmul.f32 %v1146_v13, %v1142_v15 }
 0x493   : > { %v1152_v18 = vadd.f32 %v1151_v16, %v1147_v17 }
 0x495   : > { %v1153_v19 = vmax.f32 %v1152_v18, 0.0 }
 0x497   : > { %v1154_v21 = vpack.c.bf16 %v1153_v19, %v1153_v19 }
 0x499   : > { %2056 = vmatmul.mubr.bf16.vlgmr.msra.gmra.mrb[20].mxu1 %v1154_v21 }
 0x49a   : > { %2105 = vmatprep.mubr.msk.bf16.mxu1 %vm2314_vm2, %v2313_v23  ;;  %2090 = vmatpush3.bf16.msra.mxu1 %v2235_v52 }
 0x49b   : > { %2091 = vmatprep.subr.bf16.mxu1 %v2313_v23 }
 0x56c   : > { %v1253_v22 = vpop.f32.mrb[20].mxu1 }
 0x56d   : > { %v2057_v24 = vpop.f32.mrb[21].mxu1  ;;  %2060 = vmatpush3.msk.msra.mxu0 %vm992_vm3, %v1253_v22 }
 0x56e   : > { %v1256_v25 = vpop.f32.mrb[22].mxu1  ;;  %2062 = vmatmul.mubr.msk.f32.vlgmr.msra.gmra.mrb[22].mxu0 %vm988_vm4, %v2548_v20  ;;  %2064 = vmatprep.subr.mxu0 %v2313_v23 }
 0x56f   : > { %v2058_v26 = vpop.f32.mrb[23].mxu1  ;;  %2066 = vmatprep.mubr.msk.f32.mxu0 %vm2314_vm2, %v2313_v23 }
 0x641   : > { %v1328_v27 = vpop.f32.mrb[22].mxu0 }
 0x642   : > { %v1332_v28 = vsub.f32 %v1253_v22, %v1328_v27  ;;  %v2063_v29 = vpop.f32.mrb[23].mxu0 }
 0x644   : > { %v1333_v30 = vmul.f32 %v1332_v28, %v1332_v28 }
 0x646   : > { %2065 = vmatpush3.msk.msra.mxu0 %vm992_vm3, %v1333_v30 }
 0x647   : > { %2067 = vmatmul.mubr.msk.f32.vlgmr.msra.gmra.mrb[24].mxu0 %vm988_vm4, %v2548_v20  ;;  %2069 = vmatprep.subr.bf16.mxu0 %v2313_v23  ;;  %v2236_v20 = vld [vmem:[%s2499_s5 + $0x8] sm:$0xff]  }
 0x648   : > { %2070 = vmatpush3.bf16.msra.mxu0 %v2227_v31  ;;  %2085 = vmatprep.mubr.msk.bf16.mxu0 %vm2314_vm2, %v2313_v23 }
 0x649   : > { %2071 = vmatprep.subr.bf16.mxu0 %v2313_v23  ;;  %2092 = vmatpush3.bf16.msra.mxu1 %v2236_v20 }
 0x64a   : > { %2093 = vmatprep.subr.bf16.mxu1 %v2313_v23 }
 0x64c   : > { %2072 = vmatpush3.bf16.msra.mxu0 %v2228_v32 }
 0x64d   : > { %2073 = vmatprep.subr.bf16.mxu0 %v2313_v23  ;;  %2094 = vmatpush3.bf16.msra.mxu1 %v2237_v53 }
 0x64e   : > { %2095 = vmatprep.subr.bf16.mxu1 %v2313_v23 }
 0x650   : > { %2074 = vmatpush3.bf16.msra.mxu0 %v2229_v33 }
 0x651   : > { %2075 = vmatprep.subr.bf16.mxu0 %v2313_v23  ;;  %2096 = vmatpush3.bf16.msra.mxu1 %v2238_v54 }
 0x652   : > { %2097 = vmatprep.subr.bf16.mxu1 %v2313_v23 }
 0x654   : > { %2076 = vmatpush3.bf16.msra.mxu0 %v2230_v34 }
 0x655   : > { %2077 = vmatprep.subr.bf16.mxu0 %v2313_v23  ;;  %2098 = vmatpush3.bf16.msra.mxu1 %v2239_v0 }
 0x656   : > { %2099 = vmatprep.subr.bf16.mxu1 %v2313_v23 }
 0x658   : > { %2078 = vmatpush3.bf16.msra.mxu0 %v2231_v35 }
 0x659   : > { %2079 = vmatprep.subr.bf16.mxu0 %v2313_v23  ;;  %2100 = vmatpush3.bf16.msra.mxu1 %v2240_v1 }
 0x65a   : > { %2101 = vmatprep.subr.bf16.mxu1 %v2313_v23 }
 0x65c   : > { %2080 = vmatpush3.bf16.msra.mxu0 %v2232_v36 }
 0x65d   : > { %2081 = vmatprep.subr.bf16.mxu0 %v2313_v23  ;;  %2102 = vmatpush3.bf16.msra.mxu1 %v2241_v2 }
 0x65e   : > { %2103 = vmatprep.subr.bf16.mxu1 %v2313_v23 }
 0x660   : > { %2082 = vmatpush3.bf16.msra.mxu0 %v2233_v37 }
 0x661   : > { %2083 = vmatprep.subr.bf16.mxu0 %v2313_v23  ;;  %2104 = vmatpush3.bf16.msra.mxu1 %v2242_v3 }
 0x664   : > { %2084 = vmatpush3.bf16.msra.mxu0 %v2234_v38 }
 0x71a   : > { %v1403_v39 = vpop.f32.mrb[24].mxu0 }
 0x71b   : > { %v1404_v40 = vadd.f32 1e-05, %v1403_v39  ;;  %v2068_v41 = vpop.f32.mrb[25].mxu0 }
 0x71d   : > { %2245 = vrsqrt.f32 %v1404_v40 }
 0x727   : > { %v2246_v45 = vpop.eup %2245 }
 0x728   : > { %v1408_v46 = vmul.f32 %v2246_v45, %v1332_v28 }
 0x72a   : > { %v1413_v48 = vmul.f32 %v1412_v44, %v1408_v46 }
 0x72c   : > { %v1418_v49 = vadd.f32 %v1417_v47, %v1413_v48 }
 0x72e   : > { %v1419_v50 = vmax.f32 %v1418_v49, 0.0 }
 0x730   : > { %v1420_v51 = vpack.c.bf16 %v1419_v50, %v1419_v50 }
 0x732   : > { %2086 = vmatmul.mubr.bf16.vlgmr.msra.gmra.mrb[28].mxu0 %v1420_v51 }
 0x805   : > { %v1523_v57 = vpop.f32.mrb[28].mxu0 }
 0x806   : > { %v1524_v58 = vadd.f32 %v1523_v57, %v1440_v56  ;;  %v2087_v59 = vpop.f32.mrb[29].mxu0 }
 0x807   : > { %v1526_v60 = vpop.f32.mrb[30].mxu0 }
 0x808   : > { %v2088_v61 = vpop.f32.mrb[31].mxu0  ;;  %v1529_v62 = vmul.f32 %v1524_v58, %v1524_v58 }
 0x80a   : > { %v1530_v63 = vsel %vm992_vm3, %v1529_v62, 0.0 }
 0x80b   : > { %1531 = vadd.xlane.f32.xlu0 %v1530_v63 }
 0x898   : > { %v1532_v4 = vpop.xlane.xlu0 %1531 }
 0x899   : > { %v1533_v5 = vmax.f32 %v1532_v4, 1e-24 }
 0x89b   : > { %2247 = vrsqrt.f32 %v1533_v5 }
 0x8a5   : > { %v2248_v6 = vpop.eup %2247 }
 0x8a6   : > { %v1535_v7 = vmul.f32 %v2248_v6, %v1524_v58 }
 0x8a8   : > { %v1536_v8 = vpack.c.bf16 %v1535_v7, %v1535_v7 }
 0x8aa   : > { %2106 = vmatmul.mubr.bf16.vlgmr.msra.gmra.mrb[24].mxu1 %v1536_v8 }
 0x97d   : > { %v1635_v23 = vpop.f32.mrb[24].mxu1 }
 0x97e   : > { %1641 = vst [vmem:[%s398_s17] sm:$0xf] %v1635_v23  ;;  %v2107_v9 = vpop.f32.mrb[25].mxu1 }
 0x97f   : > { %v1638_v10 = vpop.f32.mrb[26].mxu1 }
 0x980   : > { %2262 = shalt.err (!%p2259_p3)
}
 0x981   : > { %s2263_s26 = scalar_lea.hbm %s2648_s4, 64  ;;  %s2267_s16 = scalar_lea.hbm %s2697_s9, 128 }
 0x982   : > { %p2264_p4 = scmp.ne.s32.totalorder %s2648_s4, %s2263_s26  ;;  %p2268_p9 = scmp.lt.u32.totalorder %s2648_s4, %s2697_s9 }
 0x983   : > { %p2269_p10 = scmp.lt.u32.totalorder %s2267_s16, %s2263_s26  ;;  %p2271_p12 = scmp.lt.u32.totalorder %s2263_s26, %s2648_s4 }
 0x984   : > { %p2265_p7 = pnand %p2264_p4, %p2404_p5 }
 0x985   : > { %p2270_p11 = por %p2269_p10, %p2268_p9 }
 0x986   : > { %p2266_p8 = pneg %p2265_p7 }
 0x987   : > { %p2272_p13 = por %p2271_p12, %p2270_p11 }
 0x989   : > { %p2273_p0 = pnand %p2272_p13, %p2266_p8 }
 0x98b   : > { %2276 = shalt.err (!%p2273_p0)
}
 0x98c   : > { %2150 = dma.vmem_to_hbm [thread:$0]  (%p2404_p5), %s2643_s22, 64, %s2648_s4, %s1643_s14   ;;  %v2108_v11 = vpop.f32.mrb[27].mxu1 }
 0x98d PF: > { %p2156_p1 = scmp.ge.s32.totalorder %s2311_s12, 2  ;;  %s1668_s17 = sand.u32 1, %s2299_s30  }
 0x98e   : > { %s1669_s24 = scalar_lea.sflag [#allocation3], %s1668_s17 }
 0x98f   : > { %p2153_p2 = pnand %p2156_p1, %p2408_p6 }
 0x991   : > { %2294 = dma.done.wait (!%p2153_p2), %s1669_s24, 64  }
 0x992   : > { %2296 = vsyncadd (!%p2153_p2), %s1669_s24, 4294967232  ;;  %s2707_s3 = sld [smem:[#allocation5_spill]]  ;;  %p19_p3 = scmp.ge.s32.totalorder %s2391_s15, 4  }
 0x993   : > { %s2708_s30 = smov %s2303_s10  ;;  %s2709_s10 = smov %s2307_s11 }
 0x994   : > { %s2711_s12 = smov %s2391_s15  ;;  %21 = sbr.rel (!%p19_p3) target bundleno = 7 (0x7), region = 106 }
 0x998   : > { %s2710_s11 = smov %s2707_s3 }
 0x99b   :  { %1674 = vsyncpa [#allocation3], 1 }
 0x99c   :  { %1676 = vsyncpa [#allocation3 + $0x1], 1 }

</bundles_post_ra>
